<compile_context>
chip_gen: v7x
topology: tpu7x:2x2x1
jax: 0.10.0
libtpu: 0.0.40
codegen_flags: <defaults>
</compile_context>

<pallas_src>
import functools

import jax
import jax.numpy as jnp
from jax.experimental import pallas as pl
from jax.experimental.pallas import tpu as pltpu


# --------------------------------------------------------------------------
# Kernels
# --------------------------------------------------------------------------
def _ln1d_affine_kernel(x_ref, w_ref, b_ref, o_ref, *, eps):
    # x_ref/o_ref: (tile_n, C, tile_l)   w_ref/b_ref: (1, C, 1) f32 (resident)
    x = x_ref[...].astype(jnp.float32)
    mean = jnp.mean(x, axis=1, keepdims=True)             # (tn, 1, tl)
    diff = x - mean
    var = jnp.mean(diff * diff, axis=1, keepdims=True)    # biased (ddof=0)
    y = diff * jax.lax.rsqrt(var + eps)                   # rsqrt -> EUP slot
    o_ref[...] = (y * w_ref[...] + b_ref[...]).astype(o_ref.dtype)


def _ln1d_kernel(x_ref, o_ref, *, eps):
    x = x_ref[...].astype(jnp.float32)
    mean = jnp.mean(x, axis=1, keepdims=True)
    diff = x - mean
    var = jnp.mean(diff * diff, axis=1, keepdims=True)
    o_ref[...] = (diff * jax.lax.rsqrt(var + eps)).astype(o_ref.dtype)


# --------------------------------------------------------------------------
# Tile / budget selection
# --------------------------------------------------------------------------
def _cdiv(a, b):
    return (a + b - 1) // b


def _round_up(x, m):
    return _cdiv(x, m) * m


def _vmem_capacity_bytes():
    """Physical VMEM per TensorCore; conservative fallback if query fails."""
    try:
        info = pltpu.get_tpu_info()
        cap = getattr(info, "vmem_capacity_bytes", None)
        if cap:
            return int(cap)
    except Exception:
        pass
    return 64 * 1024 * 1024  # v7x-sized conservative default


def _choose_tiles(N, C, L, itemsize, budget_bytes):
    """Pick (tile_n, tile_l) so double-buffered in/out tiles + f32 temporaries
    fit in `budget_bytes`, L-tiles are 128-multiples (lane-dense stores) and
    there are >= 2 grid steps along a parallel axis when possible."""
    # Per (n, l) column of a block:
    #   2x double-buffered input + 2x double-buffered output (itemsize each)
    #   ~2x f32 temporaries inside the kernel (upcast x, centered diff)
    per_col = C * (4 * itemsize + 8)
    max_cols = max(budget_bytes // per_col, 1)

    if L <= 128:
        # Tiny L: take the full (possibly <128) lane dim; stores are masked
        # but the shape is overhead-bound anyway — amortize via N blocking.
        tile_l = L
    else:
        tile_l = min((L // 128) * 128,            # never exceed the array
                     (max_cols // 128) * 128,     # VMEM budget
                     2048)                        # past the HBM-BW knee
        tile_l = max(tile_l, 128)

    tile_n = max(1, min(N, max_cols // max(tile_l, 1)))

    # v7x megacore: guarantee >= 2 grid steps along a "parallel" axis.
    if _cdiv(N, tile_n) * _cdiv(L, tile_l) < 2:
        if N >= 2:
            tile_n = _cdiv(N, 2)
        elif L >= 256 and tile_l >= 256:
            tile_l = max(128, _round_up(_cdiv(L, 2), 128))

    return tile_n, tile_l


# --------------------------------------------------------------------------
# Wrapper
# --------------------------------------------------------------------------
def layernorm1d_pallas(x_ncl, weight=None, bias=None, *, eps=1e-5):
    """LayerNorm over the channel dim of (N, C, L); matches the torch module.

    weight/bias: optional affine params, shape (1, C, 1) or (C,).
    """
    N, C, L = x_ncl.shape
    itemsize = jnp.dtype(x_ncl.dtype).itemsize

    vmem_cap = _vmem_capacity_bytes()
    # ~48 MiB of tile traffic on 128-MiB chips (v5e/v6e), ~32 MiB on v7x.
    budget = min(vmem_cap // 2, 48 * 1024 * 1024)
    vmem_limit = int(min(vmem_cap * 3 // 4, 100 * 1024 * 1024))

    tile_n, tile_l = _choose_tiles(N, C, L, itemsize, budget)
    grid = (_cdiv(N, tile_n), _cdiv(L, tile_l))   # ragged last blocks OK

    x_spec = pl.BlockSpec((tile_n, C, tile_l), lambda n, l: (n, 0, l))
    out_spec = pl.BlockSpec((tile_n, C, tile_l), lambda n, l: (n, 0, l))

    affine = (weight is not None) or (bias is not None)
    if affine:
        w = (jnp.ones((1, C, 1), jnp.float32) if weight is None
             else jnp.asarray(weight, jnp.float32).reshape(1, C, 1))
        b = (jnp.zeros((1, C, 1), jnp.float32) if bias is None
             else jnp.asarray(bias, jnp.float32).reshape(1, C, 1))
        kernel = functools.partial(_ln1d_affine_kernel, eps=float(eps))
        in_specs = [
            x_spec,
            pl.BlockSpec((1, C, 1), lambda n, l: (0, 0, 0)),  # resident
            pl.BlockSpec((1, C, 1), lambda n, l: (0, 0, 0)),  # resident
        ]
        args = (x_ncl, w, b)
    else:
        kernel = functools.partial(_ln1d_kernel, eps=float(eps))
        in_specs = [x_spec]
        args = (x_ncl,)

    return pl.pallas_call(
        kernel,
        out_shape=jax.ShapeDtypeStruct((N, C, L), x_ncl.dtype),
        grid_spec=pltpu.PrefetchScalarGridSpec(
            num_scalar_prefetch=0,
            grid=grid,
            in_specs=in_specs,
            out_specs=out_spec,
        ),
        compiler_params=pltpu.CompilerParams(
            dimension_semantics=("parallel", "parallel"),
            vmem_limit_bytes=vmem_limit),
    )(*args)


def layernorm1d_reference(x_ncl, weight=None, bias=None, eps=1e-5):
    """Pure-JAX reference mirroring the torch module."""
    mean = jnp.mean(x_ncl, axis=1, keepdims=True)
    var = jnp.var(x_ncl, axis=1, keepdims=True)          # ddof=0 == unbiased=False
    out = (x_ncl - mean) / jnp.sqrt(var + eps)
    if weight is not None:
        out = out * weight
    if bias is not None:
        out = out + bias
    return out


if __name__ == "__main__":
    key = jax.random.PRNGKey(0)
    k_x, k_w, k_b, k_x2 = jax.random.split(key, 4)

    eps = 1e-5

    # Small shapes consistent with the module's forward: (N, channels, L).
    N, C, L = 2, 4, 16
    x = jax.random.normal(k_x, (N, C, L), dtype=jnp.float32)
    # elementwise_affine=True params (shape (1, C, 1) like the torch module);
    # perturb away from the ones/zeros init so the affine path is exercised.
    weight = 1.0 + 0.1 * jax.random.normal(k_w, (1, C, 1), dtype=jnp.float32)
    bias = 0.1 * jax.random.normal(k_b, (1, C, 1), dtype=jnp.float32)

    out = jax.block_until_ready(layernorm1d_pallas(x, weight, bias, eps=eps))
    ref = layernorm1d_reference(x, weight, bias, eps=eps)
    assert out.shape == (N, C, L), out.shape
    assert jnp.allclose(out, ref, atol=1e-5, rtol=1e-5), (
        float(jnp.max(jnp.abs(out - ref))))

    # elementwise_affine=False path.
    out_na = jax.block_until_ready(layernorm1d_pallas(x, eps=eps))
    ref_na = layernorm1d_reference(x, eps=eps)
    assert jnp.allclose(out_na, ref_na, atol=1e-5, rtol=1e-5), (
        float(jnp.max(jnp.abs(out_na - ref_na))))

    # Ragged-L path (L not a multiple of the 128-lane tile): exercises the
    # cdiv grid + masked last block.
    N2, C2, L2 = 2, 8, 200
    x2 = jax.random.normal(k_x2, (N2, C2, L2), dtype=jnp.float32)
    out2 = jax.block_until_ready(layernorm1d_pallas(x2, eps=eps))
    ref2 = layernorm1d_reference(x2, eps=eps)
    assert jnp.allclose(out2, ref2, atol=1e-5, rtol=1e-5), (
        float(jnp.max(jnp.abs(out2 - ref2))))

    print("KERNEL_OK")
</pallas_src>

<mosaic_0001>
module attributes {stable_mosaic.version = 11 : i64} {
  func.func @_ln1d_affine_kernel(%arg0: i32, %arg1: i32, %arg2: memref<1x4x16xf32, #tpu.memory_space<vmem>>, %arg3: memref<1x4x1xf32, #tpu.memory_space<vmem>>, %arg4: memref<1x4x1xf32, #tpu.memory_space<vmem>>, %arg5: memref<1x4x16xf32, #tpu.memory_space<vmem>>) attributes {dimension_semantics = [#tpu.dimension_semantics<parallel>, #tpu.dimension_semantics<parallel>], iteration_bounds = array<i64: 2, 1>, scalar_prefetch = 0 : i64, scratch_operands = 0 : i64, tpu.core_type = #tpu.core_type<tc>, window_params = [{transform_indices = @transform_0, window_bounds = array<i64: 1, 4, 16>}, {pipeline_mode = #tpu.pipeline_mode<synchronous>, transform_indices = @transform_1, window_bounds = array<i64: 1, 4, 1>}, {pipeline_mode = #tpu.pipeline_mode<synchronous>, transform_indices = @transform_2, window_bounds = array<i64: 1, 4, 1>}, {transform_indices = @transform_3, window_bounds = array<i64: 1, 4, 16>}]} {
    %c0 = arith.constant 0 : index
    %c0_0 = arith.constant 0 : index
    %c0_1 = arith.constant 0 : index
    %0 = vector.load %arg2[%c0, %c0_0, %c0_1] : memref<1x4x16xf32, #tpu.memory_space<vmem>>, vector<1x4x16xf32>
    %cst = arith.constant dense<0.000000e+00> : vector<1x16xf32>
    %1 = vector.multi_reduction <add>, %0, %cst [1] : vector<1x4x16xf32> to vector<1x16xf32>
    %2 = vector.shape_cast %1 : vector<1x16xf32> to vector<1x1x16xf32>
    %cst_2 = arith.constant 4.000000e+00 : f32
    %3 = vector.broadcast %cst_2 : f32 to vector<1x1x16xf32>
    %4 = arith.divf %2, %3 : vector<1x1x16xf32>
    %5 = vector.broadcast %4 : vector<1x1x16xf32> to vector<1x4x16xf32>
    %6 = arith.subf %0, %5 : vector<1x4x16xf32>
    %7 = arith.mulf %6, %6 : vector<1x4x16xf32>
    %cst_3 = arith.constant dense<0.000000e+00> : vector<1x16xf32>
    %8 = vector.multi_reduction <add>, %7, %cst_3 [1] : vector<1x4x16xf32> to vector<1x16xf32>
    %9 = vector.shape_cast %8 : vector<1x16xf32> to vector<1x1x16xf32>
    %cst_4 = arith.constant 4.000000e+00 : f32
    %10 = vector.broadcast %cst_4 : f32 to vector<1x1x16xf32>
    %11 = arith.divf %9, %10 : vector<1x1x16xf32>
    %cst_5 = arith.constant 9.99999974E-6 : f32
    %12 = vector.broadcast %cst_5 : f32 to vector<1x1x16xf32>
    %13 = arith.addf %11, %12 : vector<1x1x16xf32>
    %14 = math.rsqrt %13 : vector<1x1x16xf32>
    %15 = vector.broadcast %14 : vector<1x1x16xf32> to vector<1x4x16xf32>
    %16 = arith.mulf %6, %15 : vector<1x4x16xf32>
    %c0_6 = arith.constant 0 : index
    %c0_7 = arith.constant 0 : index
    %c0_8 = arith.constant 0 : index
    %17 = vector.load %arg3[%c0_6, %c0_7, %c0_8] : memref<1x4x1xf32, #tpu.memory_space<vmem>>, vector<1x4x1xf32>
    %18 = vector.broadcast %17 : vector<1x4x1xf32> to vector<1x4x16xf32>
    %19 = arith.mulf %16, %18 : vector<1x4x16xf32>
    %c0_9 = arith.constant 0 : index
    %c0_10 = arith.constant 0 : index
    %c0_11 = arith.constant 0 : index
    %20 = vector.load %arg4[%c0_9, %c0_10, %c0_11] : memref<1x4x1xf32, #tpu.memory_space<vmem>>, vector<1x4x1xf32>
    %21 = vector.broadcast %20 : vector<1x4x1xf32> to vector<1x4x16xf32>
    %22 = arith.addf %19, %21 : vector<1x4x16xf32>
    %c0_12 = arith.constant 0 : index
    %c0_13 = arith.constant 0 : index
    %c0_14 = arith.constant 0 : index
    %23 = vector.load %arg5[%c0_12, %c0_13, %c0_14] : memref<1x4x16xf32, #tpu.memory_space<vmem>>, vector<1x4x16xf32>
    tpu.vector_store %arg5[%c0_12, %c0_13, %c0_14], %22 {strides = array<i32>} : memref<1x4x16xf32, #tpu.memory_space<vmem>>, vector<1x4x16xf32>,
    return
  }
  func.func @transform_0(%arg0: i32, %arg1: i32) -> (i32, i32, i32) {
    %c0_i32 = arith.constant 0 : i32
    %c0_i32_0 = arith.constant 0 : i32
    return %arg0, %c0_i32, %arg1 : i32, i32, i32
  }
  func.func @transform_1(%arg0: i32, %arg1: i32) -> (i32, i32, i32) {
    %c0_i32 = arith.constant 0 : i32
    %c0_i32_0 = arith.constant 0 : i32
    %c0_i32_1 = arith.constant 0 : i32
    %c0_i32_2 = arith.constant 0 : i32
    return %c0_i32, %c0_i32_0, %c0_i32_1 : i32, i32, i32
  }
  func.func @transform_2(%arg0: i32, %arg1: i32) -> (i32, i32, i32) {
    %c0_i32 = arith.constant 0 : i32
    %c0_i32_0 = arith.constant 0 : i32
    %c0_i32_1 = arith.constant 0 : i32
    %c0_i32_2 = arith.constant 0 : i32
    return %c0_i32, %c0_i32_0, %c0_i32_1 : i32, i32, i32
  }
  func.func @transform_3(%arg0: i32, %arg1: i32) -> (i32, i32, i32) {
    %c0_i32 = arith.constant 0 : i32
    %c0_i32_0 = arith.constant 0 : i32
    return %arg0, %c0_i32, %arg1 : i32, i32, i32
  }
}

</mosaic_0001>

<bundles_post_ra>
// kernel: tpu_custom_call.1
= control target key start
LH: loop header
LB: loop body
LE: loop exit
PB: predicated region body
PF: predicated region fallthrough
CT: control target
= control target key end

     0   :  { %8 = vsyncpa [#allocation3], 0  ;;  %s609_s0 = inlined_call_operand.vmem [shape: f32[2,4,16], index: 0, kind: input, shape index: {}]   ;;  %s610_s1 = inlined_call_operand.vmem [shape: f32[1,4,1], index: 1, kind: input, shape index: {}]   ;;  %s611_s2 = inlined_call_operand.vmem [shape: f32[1,4,1], index: 2, kind: input, shape index: {}]   ;;  %s612_s3 = inlined_call_operand.hbm [shape: f32[2,4,16], index: 3, kind: output, shape index: {}]  }
   0x1   :  { %10 = vsyncpa [#allocation3 + $0x1], 0  ;;  %s488_s12 = smov 0   ;;  %s490_s13 = smov 0  }
   0x2   :  { %s492_s14 = smov 0   ;;  %s494_s15 = smov 0  }
   0x3   :  { %s496_s16 = smov 0   ;;  %s498_s17 = smov 0  }
   0x4 LB: > { %s316_s18 = sadd.s32 4294967295, %s464_s17   ;;  %s317_s19 = sadd.s32 4294967294, %s464_s17   ;;  %s464_s17 = sphi %s498_s17, %s16_s17   ;;  %s460_s16 = sphi %s496_s16, %s619_s16   ;;  %s456_s15 = sphi %s494_s15, %s618_s15   ;;  %s452_s14 = sphi %s492_s14, %s617_s14   ;;  %s448_s13 = sphi %s490_s13, %s616_s13   ;;  %s444_s12 = sphi %s488_s12, %s615_s12  }
   0x5   : > { %s28_s20 = sadd.s32 1, %s460_s16  ;;  %s107_s21 = sadd.s32 1, %s452_s14 }
   0x6   : > { %p30_p0 = scmp.ge.s32.totalorder %s28_s20, 2  ;;  %p117_p1 = scmp.ne.s32.totalorder %s452_s14, %s448_s13 }
   0x7   : > { %p118_p2 = scmp.eq.s32.totalorder %s316_s18, 1  ;;  %p123_p3 = scmp.ne.s32.totalorder %s448_s13, %s444_s12 }
   0x8   : > { %s621_s20 = smov (%p30_p0, %s28_s20), 0  ;;  %p124_p5 = scmp.eq.s32.totalorder %s317_s19, 1 }
   0x9   : > { %p528_p4 = por %p118_p2, %p117_p1  ;;  %s102_s23 = ssub.s32 %s460_s16, %s621_s20 }
   0xa   : > { %p320_p6 = scmp.ge.s32.totalorder %s464_s17, 1  ;;  %p105_p7 = scmp.eq.s32.totalorder %s102_s23, 0 }
   0xb   : > { %p535_p8 = por %p124_p5, %p123_p3  ;;  %p158_p9 = scmp.lt.s32.totalorder %s464_s17, 3 }
   0xc   : > { %s541_s25 = scalar_select %p105_p7, %s452_s14, %s107_s21  }
   0xd   : > { %p159_p10 = pnand %p320_p6, %p158_p9 }
   0xe   : > { %v215_v0 = vld [vmem:[%s610_s1] sm:$0xf] (!%p159_p10)  ;;  %v466_v1 = vmov (!%p159_p10), 0   ;;  %p184_p11 = scmp.lt.s32.totalorder (!%p159_p10), %s456_s15, 1  ;;  %vm192_vm0 = vcmask (!%p159_p10), 125952   ;;  %s181_s8 = sand.u32 (!%p159_p10), 1, %s448_s13  }
   0xf   : > { %162 = sbr.rel (%p159_p10) target bundleno = 164 (0xa4), region = 32  ;;  %383 = vset.pattern.permute.xlu0 (!%p159_p10), %v466_v1  ;;  %v222_v2 = vld [vmem:[%s611_s2] sm:$0xf] (!%p159_p10)  ;;  %s321_s9 = sshll.u32 (!%p159_p10), %s181_s8, 2 }
  0x10   : > { %218 = vperm.xlu0 (!%p159_p10), %383, %v215_v0   ;;  %s324_s10 = sshll.u32 (!%p159_p10), %s456_s15, 6  ;;  %s183_s11 = scalar_lea.vmem (!%p159_p10), [#allocation2], %s321_s9 }
  0x11   : > { %s245_s18 = sshll.u32 (!%p159_p10), %s183_s11, 4  ;;  %s561_s23 = scalar_lea.hbm (!%p159_p10), %s612_s3, %s324_s10  ;;  %s563_s18 = int_to_ptr.vmem [resolvable:$true] %s245_s18 }
  0x12   : > { %s231_s26 = scalar_lea.sflag (!%p159_p10), [#allocation3], %s181_s8  ;;  %s386_s27 = scalar_lea.vmem (!%p159_p10), %s563_s18, 64 }
  0x13   : > { %p387_p12 = scmp.ne.s32.totalorder (!%p159_p10), %s563_s18, %s386_s27 }
  0x14   : > { %225 = vperm.xlu0 (!%p159_p10), %383, %v222_v2  }
  0x15   : > { %p388_p13 = pnand (!%p159_p10), %p387_p12, %p528_p4 }
  0x16   : > { %s185_s30 = scalar_select %p184_p11, %s456_s15, 1 }
  0x17   : > { %p389_p0 = pneg %p388_p13  ;;  %s467_s15 = smov [#allocation2]  }
  0x18   : > { %s322_s4 = sshll.u32 %s185_s30, 2  ;;  %s390_s28 = sshll.u32 %s467_s15, 4  ;;  %s391_s28 = int_to_ptr.vmem [resolvable:$false] %s390_s28 }
  0x19   : > { %s190_s7 = scalar_lea.vmem %s609_s0, %s322_s4  ;;  %s392_s29 = scalar_lea.vmem %s391_s28, 128 }
  0x1a   : > { %v191_v3 = vld [vmem:[%s190_s7] sm:$0xf]  ;;  %p393_p1 = scmp.lt.s32.totalorder %s563_s18, %s391_s28  ;;  %p394_p2 = scmp.lt.s32.totalorder %s392_s29, %s386_s27 }
  0x1b   : > { %v193_v4 = vsel %vm192_vm0, %v191_v3, 0.0 }
  0x1c   : > { %v194_v5 = vrot.slane %v193_v4, 4  ;;  %p395_p3 = por %p394_p2, %p393_p1 }
  0x1e   : > { %v195_v6 = vadd.f32 %v194_v5, %v193_v4  ;;  %p396_p5 = pnand %p395_p3, %p389_p0 }
  0x20   : > { %v196_v7 = vrot.slane %v195_v6, 2 }
  0x22   : > { %v197_v8 = vadd.f32 %v196_v7, %v195_v6 }
  0x24   : > { %v198_v9 = vrot.slane %v197_v8, 1 }
  0x26   : > { %v199_v10 = vadd.f32 %v198_v9, %v197_v8 }
  0x28   : > { %v201_v11 = vmul.f32 0.25, %v199_v10 }
  0x2a   : > { %v202_v12 = vsub.f32 %v191_v3, %v201_v11 }
  0x2c   : > { %v203_v13 = vmul.f32 %v202_v12, %v202_v12 }
  0x2e   : > { %v204_v14 = vsel %vm192_vm0, %v203_v13, 0.0 }
  0x2f   : > { %v205_v15 = vrot.slane %v204_v14, 4 }
  0x31   : > { %v206_v16 = vadd.f32 %v205_v15, %v204_v14 }
  0x33   : > { %v207_v17 = vrot.slane %v206_v16, 2 }
  0x35   : > { %v208_v18 = vadd.f32 %v207_v17, %v206_v16 }
  0x37   : > { %v209_v19 = vrot.slane %v208_v18, 1 }
  0x39   : > { %v210_v20 = vadd.f32 %v209_v19, %v208_v18 }
  0x3b   : > { %v211_v21 = vmul.f32 0.25, %v210_v20 }
  0x3d   : > { %v212_v22 = vadd.f32 1e-05, %v211_v21 }
  0x3f   : > { %384 = vrsqrt.f32 %v212_v22 }
  0x49   : > { %v385_v23 = vpop.eup %384 }
  0x4a   : > { %v214_v24 = vmul.f32 %v385_v23, %v202_v12 }
  0x8f   : > { %v219_v25 = vpop.permute.xlu0 %218 }
  0x90   : > { %v221_v26 = vmul.f32 %v219_v25, %v214_v24 }
  0x93   : > { %v226_v27 = vpop.permute.xlu0 %225 }
  0x94   : > { %v228_v28 = vadd.f32 %v226_v27, %v221_v26 }
  0x96   : > { %229 = vst.msk [vmem:[%s183_s11] sm:$0xf] %vm192_vm0, %v228_v28 }
  0x97   : > { %399 = shalt.err (!%p396_p5)
}
  0x98   : > { %s400_s30 = scalar_lea.hbm %s561_s23, 64  ;;  %s404_s6 = scalar_lea.hbm %s612_s3, 128 }
  0x99   : > { %p401_p6 = scmp.ne.s32.totalorder %s561_s23, %s400_s30  ;;  %p405_p10 = scmp.lt.u32.totalorder %s561_s23, %s612_s3 }
  0x9a   : > { %p406_p11 = scmp.lt.u32.totalorder %s404_s6, %s400_s30  ;;  %p408_p13 = scmp.lt.u32.totalorder %s400_s30, %s561_s23 }
  0x9b   : > { %p402_p7 = pnand %p401_p6, %p528_p4 }
  0x9c   : > { %p407_p12 = por %p406_p11, %p405_p10 }
  0x9d   : > { %p403_p9 = pneg %p402_p7 }
  0x9e   : > { %p409_p0 = por %p408_p13, %p407_p12 }
  0xa0   : > { %p410_p1 = pnand %p409_p0, %p403_p9 }
  0xa2   : > { %413 = shalt.err (!%p410_p1)
}
  0xa3   : > { %327 = dma.vmem_to_hbm [thread:$0]  (%p528_p4), %s563_s18, 64, %s561_s23, %s231_s26  }
  0xa4 PF: > { %p333_p2 = scmp.ge.s32.totalorder %s464_s17, 2  ;;  %s257_s9 = sand.u32 1, %s444_s12  }
  0xa5   : > { %s258_s10 = scalar_lea.sflag [#allocation3], %s257_s9 }
  0xa6   : > { %p330_p3 = pnand %p333_p2, %p535_p8 }
  0xa8   : > { %439 = dma.done.wait (!%p330_p3), %s258_s10, 64  }
  0xa9   : > { %441 = vsyncadd (!%p330_p3), %s258_s10, 4294967232  ;;  %s16_s17 = sadd.s32 1, %s464_s17   ;;  %s615_s12 = smov %s448_s13 }
  0xaa   : > { %p13_p5 = scmp.ge.s32.totalorder %s16_s17, 4   ;;  %s616_s13 = smov %s452_s14 }
  0xab   : > { %s617_s14 = smov %s541_s25  ;;  %s618_s15 = smov %s460_s16 }
  0xac   : > { %s619_s16 = smov %s621_s20  ;;  %15 = sbr.rel (!%p13_p5) target bundleno = 4 (0x4), region = 67 }
  0xb3   :  { %263 = vsyncpa [#allocation3], 1 }
  0xb4   :  { %265 = vsyncpa [#allocation3 + $0x1], 1 }

</bundles_post_ra>
